<compile_context>
chip_gen: v7x
topology: tpu7x:2x2x1
jax: 0.10.0
libtpu: 0.0.40
codegen_flags: <defaults>
</compile_context>

<pallas_src>
import functools

import jax
import jax.numpy as jnp
from jax.experimental import pallas as pl
from jax.experimental.pallas import tpu as pltpu

EPS = 1e-5


def _vmem_limit_bytes():
    """Scoped-VMEM request that fits every TPU generation (v7x: 64 MiB/TC)."""
    try:
        cap = int(pltpu.get_tpu_info().vmem_capacity_bytes)
    except Exception:
        cap = 64 * 1024 * 1024          # v7x-safe fallback
    # leave 16 MiB headroom, never ask for more than 96 MiB
    return max(32 * 1024 * 1024, min(cap - 16 * 1024 * 1024, 96 * 1024 * 1024))


def _transform(ctx, w1t, b1, g, be, w2t, b2):
    """conv1x1 -> LayerNorm(mid) -> ReLU -> conv1x1 on a (bt, C) f32 context."""
    t1 = jnp.dot(ctx, w1t, preferred_element_type=jnp.float32) + b1   # (bt, mid)
    mean = jnp.mean(t1, axis=-1, keepdims=True)
    var = jnp.mean((t1 - mean) ** 2, axis=-1, keepdims=True)
    t1n = (t1 - mean) * jax.lax.rsqrt(var + EPS)
    t1n = t1n * g + be
    h = jnp.maximum(t1n, 0.0)
    return jnp.dot(h, w2t, preferred_element_type=jnp.float32) + b2   # (bt, C)


# ---------------------------------------------------------------------------
# Main single-pass kernel: one batch tile holds the full (C, HW) slab.
# ---------------------------------------------------------------------------
def gc_kernel(x_ref, wk_ref, bk_ref, w1t_ref, b1_ref, g_ref, be_ref,
              w2t_ref, b2_ref, o_ref):
    x = x_ref[...]                                   # (bt, C, HW) native dtype
    bt, c, _ = x.shape

    # attention logits per spatial position (MXU): (bt,1,C)@(bt,C,HW)->(bt,1,HW)
    wk_b = jnp.broadcast_to(wk_ref[...][None], (bt, 1, c))
    attn = jnp.einsum('boc,bcs->bos', wk_b, x,
                      preferred_element_type=jnp.float32)
    attn = attn + bk_ref[0, 0]                       # conv bias (SMEM scalar)

    # context[b,c] = sum_s x[b,c,s] * attn[b,s]  (contract on HW, MXU)
    ctx = jnp.einsum('bos,bcs->boc', attn.astype(x.dtype), x,
                     preferred_element_type=jnp.float32)[:, 0, :]    # (bt, C)

    y = _transform(ctx, w1t_ref[...], b1_ref[...], g_ref[...], be_ref[...],
                   w2t_ref[...], b2_ref[...])                        # (bt, C)

    # residual add in the input dtype (no f32 slab copy)
    o_ref[...] = (x + y.astype(x.dtype)[:, :, None]).astype(o_ref.dtype)


# ---------------------------------------------------------------------------
# HW-chunked fallback: pass 1 accumulates ctx over HW chunks and produces y,
# pass 2 streams the residual add.  Used when a single-batch slab exceeds the
# VMEM budget (mostly v7x / very large C*HW).
# ---------------------------------------------------------------------------
def gc_ctx_kernel(hw_total, x_ref, wk_ref, bk_ref, w1t_ref, b1_ref, g_ref,
                  be_ref, w2t_ref, b2_ref, y_ref, ctx_acc):
    s = pl.program_id(1)

    @pl.when(s == 0)
    def _():
        ctx_acc[...] = jnp.zeros_like(ctx_acc)

    x = x_ref[...]                                   # (1, C, hw_chunk)
    bt, c, hw_chunk = x.shape
    # Mask the spatial tail of the last chunk: Pallas pads edge blocks with
    # undefined values which must not leak into the ctx reduction.
    col = jax.lax.broadcasted_iota(jnp.int32, (1, 1, hw_chunk), 2) + s * hw_chunk
    x = jnp.where(col < hw_total, x, jnp.zeros_like(x))

    wk_b = jnp.broadcast_to(wk_ref[...][None], (bt, 1, c))
    attn = jnp.einsum('boc,bcs->bos', wk_b, x,
                      preferred_element_type=jnp.float32) + bk_ref[0, 0]
    ctx_acc[...] += jnp.einsum('bos,bcs->boc', attn.astype(x.dtype), x,
                               preferred_element_type=jnp.float32)[:, 0, :]

    @pl.when(s == pl.num_programs(1) - 1)
    def _():
        y = _transform(ctx_acc[...], w1t_ref[...], b1_ref[...], g_ref[...],
                       be_ref[...], w2t_ref[...], b2_ref[...])       # (1, C)
        y_ref[...] = y[:, :, None]                                   # (1, C, 1)


def gc_add_kernel(x_ref, y_ref, o_ref):
    x = x_ref[...]                                   # (1, C, hw_chunk)
    y = y_ref[...]                                   # (1, C, 1) f32
    o_ref[...] = (x + y.astype(x.dtype)).astype(o_ref.dtype)


# ---------------------------------------------------------------------------
# Wrappers
# ---------------------------------------------------------------------------
def _prep_params(dtype, wk, w1, b1, gamma, beta, w2, b2):
    mid, C = w1.shape
    wk_c = wk.reshape(1, C).astype(dtype)            # match x dtype for MXU
    w1t = w1.T.astype(jnp.float32)                   # (C, mid)
    w2t = w2.T.astype(jnp.float32)                   # (mid, C)
    b1r = b1.reshape(1, mid).astype(jnp.float32)
    gr = gamma.reshape(1, mid).astype(jnp.float32)
    ber = beta.reshape(1, mid).astype(jnp.float32)
    b2r = b2.reshape(1, C).astype(jnp.float32)
    return wk_c, w1t, b1r, gr, ber, w2t, b2r


def _pick_bt(B, per_batch, budget, target_steps=4):
    """Largest batch tile that fits VMEM while keeping >= ~target_steps steps."""
    bt = max(1, min(B, budget // per_batch))
    if B >= 2:
        bt = min(bt, max(1, B // target_steps))      # keep the pipeline / 2 TCs busy
    best_div = 1
    for d in range(bt, 0, -1):                       # prefer an exact tiling of B
        if B % d == 0:
            best_div = d
            break
    if 2 * best_div >= bt:                           # unless it shrinks blocks >2x
        bt = best_div                                # (masked tail block is also OK)
    return max(1, bt)


def _forward_single(x3, bk_r, wk_c, w1t, b1r, gr, ber, w2t, b2r, bt, vmem_limit):
    B, C, HW = x3.shape
    mid = w1t.shape[1]
    itemsize = jnp.dtype(x3.dtype).itemsize
    n_steps = pl.cdiv(B, bt)
    cost = pl.CostEstimate(flops=int(5 * B * C * HW), transcendentals=int(B),
                           bytes_accessed=int(2 * B * C * HW * itemsize))
    return pl.pallas_call(
        gc_kernel,
        out_shape=jax.ShapeDtypeStruct((B, C, HW), x3.dtype),
        grid=(n_steps,),
        in_specs=[
            pl.BlockSpec((bt, C, HW), lambda b: (b, 0, 0)),        # x
            pl.BlockSpec((1, C), lambda b: (0, 0)),                # wk (conv C->1)
            pl.BlockSpec(memory_space=pltpu.MemorySpace.SMEM),     # bk (scalar)
            pl.BlockSpec((C, mid), lambda b: (0, 0)),              # w1.T
            pl.BlockSpec((1, mid), lambda b: (0, 0)),              # b1
            pl.BlockSpec((1, mid), lambda b: (0, 0)),              # LN gamma
            pl.BlockSpec((1, mid), lambda b: (0, 0)),              # LN beta
            pl.BlockSpec((mid, C), lambda b: (0, 0)),              # w2.T
            pl.BlockSpec((1, C), lambda b: (0, 0)),                # b2
        ],
        out_specs=pl.BlockSpec((bt, C, HW), lambda b: (b, 0, 0)),
        compiler_params=pltpu.CompilerParams(
            dimension_semantics=("parallel",),
            vmem_limit_bytes=vmem_limit),
        cost_estimate=cost,
    )(x3, wk_c, bk_r, w1t, b1r, gr, ber, w2t, b2r)


def _forward_chunked(x3, bk_r, wk_c, w1t, b1r, gr, ber, w2t, b2r,
                     vmem_limit, max_chunk_cap=None):
    B, C, HW = x3.shape
    mid = w1t.shape[1]
    itemsize = jnp.dtype(x3.dtype).itemsize
    budget = int(vmem_limit * 0.75)
    # in + out double-buffered plus ~2 block-sized temporaries, per spatial col
    bytes_per_col = (2 * 2 + 2) * C * itemsize
    max_chunk = max(128, (budget // bytes_per_col) // 128 * 128)
    if max_chunk_cap is not None:
        max_chunk = min(max_chunk, max_chunk_cap)
    hw_chunk = HW if HW <= max_chunk else max_chunk   # full extent or x128 chunk
    n_s = pl.cdiv(HW, hw_chunk)

    # Pass 1: accumulate ctx over HW chunks; apply the transform on the last.
    y = pl.pallas_call(
        functools.partial(gc_ctx_kernel, HW),
        out_shape=jax.ShapeDtypeStruct((B, C, 1), jnp.float32),
        grid=(B, n_s),
        in_specs=[
            pl.BlockSpec((1, C, hw_chunk), lambda b, s: (b, 0, s)),
            pl.BlockSpec((1, C), lambda b, s: (0, 0)),
            pl.BlockSpec(memory_space=pltpu.MemorySpace.SMEM),
            pl.BlockSpec((C, mid), lambda b, s: (0, 0)),
            pl.BlockSpec((1, mid), lambda b, s: (0, 0)),
            pl.BlockSpec((1, mid), lambda b, s: (0, 0)),
            pl.BlockSpec((1, mid), lambda b, s: (0, 0)),
            pl.BlockSpec((mid, C), lambda b, s: (0, 0)),
            pl.BlockSpec((1, C), lambda b, s: (0, 0)),
        ],
        out_specs=pl.BlockSpec((1, C, 1), lambda b, s: (b, 0, 0)),
        scratch_shapes=[pltpu.VMEM((1, C), jnp.float32)],
        compiler_params=pltpu.CompilerParams(
            dimension_semantics=("parallel", "arbitrary"),
            vmem_limit_bytes=vmem_limit),
        cost_estimate=pl.CostEstimate(
            flops=int(4 * B * C * HW), transcendentals=int(B),
            bytes_accessed=int(B * C * HW * itemsize)),
    )(x3, wk_c, bk_r, w1t, b1r, gr, ber, w2t, b2r)

    # Pass 2: streaming residual add out[b,c,s] = x[b,c,s] + y[b,c].
    out3 = pl.pallas_call(
        gc_add_kernel,
        out_shape=jax.ShapeDtypeStruct((B, C, HW), x3.dtype),
        grid=(B, n_s),
        in_specs=[
            pl.BlockSpec((1, C, hw_chunk), lambda b, s: (b, 0, s)),
            pl.BlockSpec((1, C, 1), lambda b, s: (b, 0, 0)),
        ],
        out_specs=pl.BlockSpec((1, C, hw_chunk), lambda b, s: (b, 0, s)),
        compiler_params=pltpu.CompilerParams(
            dimension_semantics=("parallel", "parallel"),
            vmem_limit_bytes=vmem_limit),
        cost_estimate=pl.CostEstimate(
            flops=int(B * C * HW), transcendentals=0,
            bytes_accessed=int(2 * B * C * HW * itemsize)),
    )(x3, y)
    return out3


@jax.jit
def gc_module_forward(x, wk, bk, w1, b1, gamma, beta, w2, b2):
    B, C, H, W = x.shape
    HW = H * W
    mid = w1.shape[0]
    itemsize = jnp.dtype(x.dtype).itemsize

    x3 = x.reshape(B, C, HW)                          # bitcast, no HBM copy
    wk_c, w1t, b1r, gr, ber, w2t, b2r = _prep_params(
        x.dtype, wk, w1, b1, gamma, beta, w2, b2)
    bk_r = bk.reshape(1, 1).astype(jnp.float32)

    vmem_limit = _vmem_limit_bytes()
    # resident params (double-buffered by the pipeline) + 1 MiB slack
    weight_bytes = 2 * 4 * (2 * C * mid + 3 * mid + 2 * C)
    budget = int(vmem_limit * 0.75) - weight_bytes - (1 << 20)
    # per-batch VMEM: in + out blocks (double-buffered) + ~1 block of in-kernel
    # temporaries (attention rows, residual-add staging).
    per_batch = 4 * C * HW * itemsize + C * HW * itemsize + 8 * HW

    if per_batch <= budget:
        bt = _pick_bt(B, per_batch, budget)
        out3 = _forward_single(x3, bk_r, wk_c, w1t, b1r, gr, ber, w2t, b2r,
                               bt, vmem_limit)
    else:
        # Even a single-batch slab doesn't fit (mostly a v7x 64 MiB concern):
        # two-pass HW-chunked path, paying one extra HBM read of x.
        out3 = _forward_chunked(x3, bk_r, wk_c, w1t, b1r, gr, ber, w2t, b2r,
                                vmem_limit)
    return out3.reshape(B, C, H, W)


def gc_module_forward_chunked(x, wk, bk, w1, b1, gamma, beta, w2, b2,
                              max_chunk_cap=None):
    """Entry point that always uses the two-pass chunked path (for testing /
    very large C*HW)."""
    B, C, H, W = x.shape
    HW = H * W
    x3 = x.reshape(B, C, HW)
    wk_c, w1t, b1r, gr, ber, w2t, b2r = _prep_params(
        x.dtype, wk, w1, b1, gamma, beta, w2, b2)
    bk_r = bk.reshape(1, 1).astype(jnp.float32)
    out3 = _forward_chunked(x3, bk_r, wk_c, w1t, b1r, gr, ber, w2t, b2r,
                            _vmem_limit_bytes(), max_chunk_cap=max_chunk_cap)
    return out3.reshape(B, C, H, W)


def gc_module_reference(x, wk, bk, w1, b1, gamma, beta, w2, b2):
    """Pure-JAX reference mirroring the PyTorch forward."""
    B, C, H, W = x.shape
    x3 = x.reshape(B, C, H * W)
    attn = jnp.einsum('c,bcs->bs', wk[0], x3) + bk[0, 0]          # (B, HW)
    ctx = jnp.einsum('bcs,bs->bc', x3, attn)                      # (B, C)
    t1 = ctx @ w1.T + b1[:, 0]                                    # (B, mid)
    mean = t1.mean(-1, keepdims=True)
    var = ((t1 - mean) ** 2).mean(-1, keepdims=True)
    t1n = (t1 - mean) / jnp.sqrt(var + EPS) * gamma[:, 0] + beta[:, 0]
    h = jnp.maximum(t1n, 0.0)
    y = h @ w2.T + b2[:, 0]                                       # (B, C)
    return x + y[:, :, None, None]


if __name__ == "__main__":
    # Small shapes consistent with the module: channel=32, reduction=16 -> mid=2
    B, C, H, W = 2, 32, 16, 16
    reduction = 16
    mid = C // reduction

    key = jax.random.PRNGKey(0)
    keys = jax.random.split(key, 10)

    x = jax.random.normal(keys[0], (B, C, H, W), dtype=jnp.float32)

    # Deterministic parameter init (shapes follow the PyTorch module __init__).
    wk = 0.05 * jax.random.normal(keys[1], (1, C), dtype=jnp.float32)     # conv C->1
    bk = 0.05 * jax.random.normal(keys[2], (1, 1), dtype=jnp.float32)
    w1 = 0.05 * jax.random.normal(keys[3], (mid, C), dtype=jnp.float32)   # conv C->mid
    b1 = 0.05 * jax.random.normal(keys[4], (mid, 1), dtype=jnp.float32)
    gamma = jnp.ones((mid, 1), dtype=jnp.float32)                         # LayerNorm affine
    beta = jnp.zeros((mid, 1), dtype=jnp.float32)
    w2 = 0.05 * jax.random.normal(keys[5], (C, mid), dtype=jnp.float32)   # conv mid->C
    b2 = 0.05 * jax.random.normal(keys[6], (C, 1), dtype=jnp.float32)

    ref = gc_module_reference(x, wk, bk, w1, b1, gamma, beta, w2, b2)

    # Main (single-pass) path.
    out = gc_module_forward(x, wk, bk, w1, b1, gamma, beta, w2, b2)
    out = jax.block_until_ready(out)
    assert out.shape == (B, C, H, W)
    assert jnp.allclose(out, ref, rtol=1e-3, atol=1e-3), (
        float(jnp.max(jnp.abs(out - ref))))

    # Also exercise the HW-chunked fallback path (forced 128-wide chunks).
    out_c = gc_module_forward_chunked(x, wk, bk, w1, b1, gamma, beta, w2, b2,
                                      max_chunk_cap=128)
    out_c = jax.block_until_ready(out_c)
    assert jnp.allclose(out_c, ref, rtol=1e-3, atol=1e-3), (
        float(jnp.max(jnp.abs(out_c - ref))))

    print("KERNEL_OK")
</pallas_src>

<mosaic_0001>
module attributes {stable_mosaic.version = 11 : i64} {
  func.func @gc_kernel(%arg0: i32, %arg1: memref<1x32x256xf32, #tpu.memory_space<vmem>>, %arg2: memref<1x32xf32, #tpu.memory_space<vmem>>, %arg3: memref<1x1xf32, #tpu.memory_space<smem>>, %arg4: memref<32x2xf32, #tpu.memory_space<vmem>>, %arg5: memref<1x2xf32, #tpu.memory_space<vmem>>, %arg6: memref<1x2xf32, #tpu.memory_space<vmem>>, %arg7: memref<1x2xf32, #tpu.memory_space<vmem>>, %arg8: memref<2x32xf32, #tpu.memory_space<vmem>>, %arg9: memref<1x32xf32, #tpu.memory_space<vmem>>, %arg10: memref<1x32x256xf32, #tpu.memory_space<vmem>>) attributes {dimension_semantics = [#tpu.dimension_semantics<parallel>], iteration_bounds = array<i64: 2>, scalar_prefetch = 0 : i64, scratch_operands = 0 : i64, tpu.core_type = #tpu.core_type<tc>, window_params = [{transform_indices = @transform_0, window_bounds = array<i64: 1, 32, 256>}, {pipeline_mode = #tpu.pipeline_mode<synchronous>, transform_indices = @transform_1, window_bounds = array<i64: 1, 32>}, {transform_indices = @transform_2, window_bounds = array<i64: 1, 1>}, {pipeline_mode = #tpu.pipeline_mode<synchronous>, transform_indices = @transform_3, window_bounds = array<i64: 32, 2>}, {pipeline_mode = #tpu.pipeline_mode<synchronous>, transform_indices = @transform_4, window_bounds = array<i64: 1, 2>}, {pipeline_mode = #tpu.pipeline_mode<synchronous>, transform_indices = @transform_5, window_bounds = array<i64: 1, 2>}, {pipeline_mode = #tpu.pipeline_mode<synchronous>, transform_indices = @transform_6, window_bounds = array<i64: 1, 2>}, {pipeline_mode = #tpu.pipeline_mode<synchronous>, transform_indices = @transform_7, window_bounds = array<i64: 2, 32>}, {pipeline_mode = #tpu.pipeline_mode<synchronous>, transform_indices = @transform_8, window_bounds = array<i64: 1, 32>}, {transform_indices = @transform_9, window_bounds = array<i64: 1, 32, 256>}]} {
    %c0 = arith.constant 0 : index
    %c0_0 = arith.constant 0 : index
    %c0_1 = arith.constant 0 : index
    %0 = vector.load %arg1[%c0, %c0_0, %c0_1] : memref<1x32x256xf32, #tpu.memory_space<vmem>>, vector<1x32x256xf32>
    %c0_2 = arith.constant 0 : index
    %c0_3 = arith.constant 0 : index
    %1 = vector.load %arg2[%c0_2, %c0_3] : memref<1x32xf32, #tpu.memory_space<vmem>>, vector<1x32xf32>
    %2 = vector.shape_cast %1 : vector<1x32xf32> to vector<1x1x32xf32>
    "tpu.trace_start"() <{level = 10 : i32, message = "boc,bcs->bos"}> : () -> ()
    %cst = arith.constant dense<0.000000e+00> : vector<1x1x256xf32>
    %3 = tpu.matmul %2, %0, %cst {dimension_numbers = #tpu.dot_dimension_numbers<[2], [1], [1], [2], [0, 0, 0, 1, 1, 2], [0], [0]>} : vector<1x1x32xf32>, vector<1x32x256xf32>, vector<1x1x256xf32> -> vector<1x1x256xf32>
    "tpu.trace_stop"() : () -> ()
    %c0_4 = arith.constant 0 : index
    %c0_5 = arith.constant 0 : index
    %4 = memref.load %arg3[%c0_4, %c0_5] : memref<1x1xf32, #tpu.memory_space<smem>>
    %5 = vector.broadcast %4 : f32 to vector<1x1x256xf32>
    %6 = arith.addf %3, %5 : vector<1x1x256xf32>
    "tpu.trace_start"() <{level = 10 : i32, message = "bos,bcs->boc"}> : () -> ()
    %cst_6 = arith.constant dense<0.000000e+00> : vector<1x1x32xf32>
    %7 = tpu.matmul %6, %0, %cst_6 {dimension_numbers = #tpu.dot_dimension_numbers<[2], [2], [1], [1], [0, 0, 0, 1, 1, 1], [0], [0]>} : vector<1x1x256xf32>, vector<1x32x256xf32>, vector<1x1x32xf32> -> vector<1x1x32xf32>
    "tpu.trace_stop"() : () -> ()
    %8 = vector.shape_cast %7 : vector<1x1x32xf32> to vector<1x32xf32>
    %c0_7 = arith.constant 0 : index
    %c0_8 = arith.constant 0 : index
    %9 = vector.load %arg4[%c0_7, %c0_8] : memref<32x2xf32, #tpu.memory_space<vmem>>, vector<32x2xf32>
    %c0_9 = arith.constant 0 : index
    %c0_10 = arith.constant 0 : index
    %10 = vector.load %arg5[%c0_9, %c0_10] : memref<1x2xf32, #tpu.memory_space<vmem>>, vector<1x2xf32>
    %c0_11 = arith.constant 0 : index
    %c0_12 = arith.constant 0 : index
    %11 = vector.load %arg6[%c0_11, %c0_12] : memref<1x2xf32, #tpu.memory_space<vmem>>, vector<1x2xf32>
    %c0_13 = arith.constant 0 : index
    %c0_14 = arith.constant 0 : index
    %12 = vector.load %arg7[%c0_13, %c0_14] : memref<1x2xf32, #tpu.memory_space<vmem>>, vector<1x2xf32>
    %c0_15 = arith.constant 0 : index
    %c0_16 = arith.constant 0 : index
    %13 = vector.load %arg8[%c0_15, %c0_16] : memref<2x32xf32, #tpu.memory_space<vmem>>, vector<2x32xf32>
    %c0_17 = arith.constant 0 : index
    %c0_18 = arith.constant 0 : index
    %14 = vector.load %arg9[%c0_17, %c0_18] : memref<1x32xf32, #tpu.memory_space<vmem>>, vector<1x32xf32>
    %cst_19 = arith.constant dense<0.000000e+00> : vector<1x2xf32>
    %15 = tpu.matmul %8, %9, %cst_19 {dimension_numbers = #tpu.dot_dimension_numbers<[1], [0], [0], [1], [0, 0, 1, 1], [], []>} : vector<1x32xf32>, vector<32x2xf32>, vector<1x2xf32> -> vector<1x2xf32>
    %16 = arith.addf %15, %10 : vector<1x2xf32>
    %cst_20 = arith.constant dense<0.000000e+00> : vector<1xf32>
    %17 = vector.multi_reduction <add>, %16, %cst_20 [1] : vector<1x2xf32> to vector<1xf32>
    %18 = vector.shape_cast %17 : vector<1xf32> to vector<1x1xf32>
    %cst_21 = arith.constant 2.000000e+00 : f32
    %19 = vector.broadcast %cst_21 : f32 to vector<1x1xf32>
    %20 = arith.divf %18, %19 : vector<1x1xf32>
    %21 = vector.broadcast %20 : vector<1x1xf32> to vector<1x2xf32>
    %22 = arith.subf %16, %21 : vector<1x2xf32>
    %23 = arith.mulf %22, %22 : vector<1x2xf32>
    %cst_22 = arith.constant dense<0.000000e+00> : vector<1xf32>
    %24 = vector.multi_reduction <add>, %23, %cst_22 [1] : vector<1x2xf32> to vector<1xf32>
    %25 = vector.shape_cast %24 : vector<1xf32> to vector<1x1xf32>
    %cst_23 = arith.constant 2.000000e+00 : f32
    %26 = vector.broadcast %cst_23 : f32 to vector<1x1xf32>
    %27 = arith.divf %25, %26 : vector<1x1xf32>
    %28 = vector.broadcast %20 : vector<1x1xf32> to vector<1x2xf32>
    %29 = arith.subf %16, %28 : vector<1x2xf32>
    %cst_24 = arith.constant 9.99999974E-6 : f32
    %30 = vector.broadcast %cst_24 : f32 to vector<1x1xf32>
    %31 = arith.addf %27, %30 : vector<1x1xf32>
    %32 = math.rsqrt %31 : vector<1x1xf32>
    %33 = vector.broadcast %32 : vector<1x1xf32> to vector<1x2xf32>
    %34 = arith.mulf %29, %33 : vector<1x2xf32>
    %35 = arith.mulf %34, %11 : vector<1x2xf32>
    %36 = arith.addf %35, %12 : vector<1x2xf32>
    %cst_25 = arith.constant 0.000000e+00 : f32
    %37 = vector.broadcast %cst_25 : f32 to vector<1x2xf32>
    %38 = arith.maximumf %36, %37 : vector<1x2xf32>
    %cst_26 = arith.constant dense<0.000000e+00> : vector<1x32xf32>
    %39 = tpu.matmul %38, %13, %cst_26 {dimension_numbers = #tpu.dot_dimension_numbers<[1], [0], [0], [1], [0, 0, 1, 1], [], []>} : vector<1x2xf32>, vector<2x32xf32>, vector<1x32xf32> -> vector<1x32xf32>
    %40 = arith.addf %39, %14 : vector<1x32xf32>
    %41 = vector.shape_cast %40 : vector<1x32xf32> to vector<1x32x1xf32>
    %42 = vector.broadcast %41 : vector<1x32x1xf32> to vector<1x32x256xf32>
    %43 = arith.addf %0, %42 : vector<1x32x256xf32>
    %c0_27 = arith.constant 0 : index
    %c0_28 = arith.constant 0 : index
    %c0_29 = arith.constant 0 : index
    %44 = vector.load %arg10[%c0_27, %c0_28, %c0_29] : memref<1x32x256xf32, #tpu.memory_space<vmem>>, vector<1x32x256xf32>
    tpu.vector_store %arg10[%c0_27, %c0_28, %c0_29], %43 {strides = array<i32>} : memref<1x32x256xf32, #tpu.memory_space<vmem>>, vector<1x32x256xf32>,
    return
  }
  func.func @transform_0(%arg0: i32) -> (i32, i32, i32) {
    %c0_i32 = arith.constant 0 : i32
    %c0_i32_0 = arith.constant 0 : i32
    %c0_i32_1 = arith.constant 0 : i32
    return %arg0, %c0_i32, %c0_i32_0 : i32, i32, i32
  }
  func.func @transform_1(%arg0: i32) -> (i32, i32) {
    %c0_i32 = arith.constant 0 : i32
    %c0_i32_0 = arith.constant 0 : i32
    %c0_i32_1 = arith.constant 0 : i32
    return %c0_i32, %c0_i32_0 : i32, i32
  }
  func.func @transform_2(%arg0: i32) -> (i32, i32) {
    %c0_i32 = arith.constant 0 : i32
    %c0_i32_0 = arith.constant 0 : i32
    %c0_i32_1 = arith.constant 0 : i32
    return %c0_i32, %c0_i32_0 : i32, i32
  }
  func.func @transform_3(%arg0: i32) -> (i32, i32) {
    %c0_i32 = arith.constant 0 : i32
    %c0_i32_0 = arith.constant 0 : i32
    %c0_i32_1 = arith.constant 0 : i32
    return %c0_i32, %c0_i32_0 : i32, i32
  }
  func.func @transform_4(%arg0: i32) -> (i32, i32) {
    %c0_i32 = arith.constant 0 : i32
    %c0_i32_0 = arith.constant 0 : i32
    %c0_i32_1 = arith.constant 0 : i32
    return %c0_i32, %c0_i32_0 : i32, i32
  }
  func.func @transform_5(%arg0: i32) -> (i32, i32) {
    %c0_i32 = arith.constant 0 : i32
    %c0_i32_0 = arith.constant 0 : i32
    %c0_i32_1 = arith.constant 0 : i32
    return %c0_i32, %c0_i32_0 : i32, i32
  }
  func.func @transform_6(%arg0: i32) -> (i32, i32) {
    %c0_i32 = arith.constant 0 : i32
    %c0_i32_0 = arith.constant 0 : i32
    %c0_i32_1 = arith.constant 0 : i32
    return %c0_i32, %c0_i32_0 : i32, i32
  }
  func.func @transform_7(%arg0: i32) -> (i32, i32) {
    %c0_i32 = arith.constant 0 : i32
    %c0_i32_0 = arith.constant 0 : i32
    %c0_i32_1 = arith.constant 0 : i32
    return %c0_i32, %c0_i32_0 : i32, i32
  }
  func.func @transform_8(%arg0: i32) -> (i32, i32) {
    %c0_i32 = arith.constant 0 : i32
    %c0_i32_0 = arith.constant 0 : i32
    %c0_i32_1 = arith.constant 0 : i32
    return %c0_i32, %c0_i32_0 : i32, i32
  }
  func.func @transform_9(%arg0: i32) -> (i32, i32, i32) {
    %c0_i32 = arith.constant 0 : i32
    %c0_i32_0 = arith.constant 0 : i32
    %c0_i32_1 = arith.constant 0 : i32
    return %arg0, %c0_i32, %c0_i32_0 : i32, i32, i32
  }
}

</mosaic_0001>

<bundles_post_ra>
// kernel: gc_module_forward.1
= control target key start
LH: loop header
LB: loop body
LE: loop exit
PB: predicated region body
PF: predicated region fallthrough
CT: control target
= control target key end

     0   :  { %s897_s11 = smov 0   ;;  %s985_s0 = inlined_call_operand.vmem [shape: f32[2,32,256], index: 0, kind: input, shape index: {}]   ;;  %s986_s1 = inlined_call_operand.vmem [shape: f32[1,32], index: 1, kind: input, shape index: {}]   ;;  %s987_s2 = inlined_call_operand.<no memory space> [shape: f32[1,1], index: 2, kind: input, shape index: {}]   ;;  %s988_s3 = inlined_call_operand.vmem [shape: f32[32,2], index: 3, kind: input, shape index: {}]   ;;  %s989_s4 = inlined_call_operand.vmem [shape: f32[1,2], index: 4, kind: input, shape index: {}]   ;;  %s990_s5 = inlined_call_operand.vmem [shape: f32[1,2], index: 5, kind: input, shape index: {}]   ;;  %s991_s6 = inlined_call_operand.vmem [shape: f32[1,2], index: 6, kind: input, shape index: {}]   ;;  %s992_s7 = inlined_call_operand.vmem [shape: f32[2,32], index: 7, kind: input, shape index: {}]   ;;  %s993_s8 = inlined_call_operand.vmem [shape: f32[1,32], index: 8, kind: input, shape index: {}]   ;;  %s994_s9 = inlined_call_operand.vmem [shape: f32[2,32,256], index: 9, kind: output, shape index: {}]  }
   0x1   :  { %14 = sst [smem:[#allocation2]] %s987_s2 }
   0x2 LB: > { %s758_s12 = sadd.s32 4294967295, %s839_s11   ;;  %p762_p0 = scmp.ge.s32.totalorder %s839_s11, 1  ;;  %s839_s11 = sphi %s897_s11, %s20_s11  }
   0x3   : > { %p288_p1 = scmp.lt.s32.totalorder %s839_s11, 3 }
   0x5   : > { %p289_p2 = pnand %p762_p0, %p288_p1 }
   0x6   : > { %p324_p3 = scmp.lt.s32.totalorder (!%p289_p2), %s758_s12, 1  ;;  %v841_v0 = vmov (!%p289_p2), 0.0   ;;  %v342_v13 = vld [vmem:[%s986_s1] sm:$0x1] (!%p289_p2)  ;;  %vm345_vm0 = vcmask (!%p289_p2), 261120   ;;  %v491_v15 = vld [vmem:[%s988_s3 + $0x8] sm:$0xff] (!%p289_p2)  ;;  %v668_v49 = vlaneseq (!%p289_p2) }
   0x7   : > { %292 = sbr.rel (%p289_p2) target bundleno = 1327 (0x52f), region = 56  ;;  %413 = vmatprep.mubr.f32.mxu0 (!%p289_p2), %v841_v0  ;;  %v490_v14 = vld [vmem:[%s988_s3] sm:$0xff] (!%p289_p2)  ;;  %v492_v16 = vld [vmem:[%s988_s3 + $0x10] sm:$0xff] (!%p289_p2)  ;;  %v842_v17 = vmov (!%p289_p2), 0.0|0.0   ;;  %v493_v19 = vld [vmem:[%s988_s3 + $0x18] sm:$0xff] (!%p289_p2)  ;;  %s343_s26 = sld [smem:[#allocation2]] (!%p289_p2) }
   0x8   : > { %v815_v18 = vpack.c.bf16 (!%p289_p2), %v491_v15, %v490_v14  ;;  %v818_v20 = vpack.c.bf16 (!%p289_p2), %v493_v19, %v492_v16  ;;  %vm843_vm1 = vmmov (!%p289_p2), 0   ;;  %v494_v28 = vld [vmem:[%s989_s4] sm:$0x1] (!%p289_p2)  ;;  %vm572_vm2 = vcmask (!%p289_p2), 8192  }
   0x9   : > { %v497_v38 = vld [vmem:[%s992_s7] sm:$0x3] (!%p289_p2)  ;;  %vm594_vm3 = vcmask (!%p289_p2), 1041408   ;;  %vm590_vm4 = vcmask (!%p289_p2), 15360   ;;  %v669_v50 = vshrl.u32 (!%p289_p2), %v668_v49, 7 }
   0xa   : > { %v495_v43 = vld [vmem:[%s990_s5] sm:$0x1] (!%p289_p2) }
   0xb   : > { %v496_v45 = vld [vmem:[%s991_s6] sm:$0x1] (!%p289_p2)  ;;  %v670_v52 = vsub.s32 (!%p289_p2), 0, %v669_v50 }
   0xc   : > { %v498_v51 = vld [vmem:[%s993_s8] sm:$0x1] (!%p289_p2) }
   0xd   : > { %v344_v21 = vstv (!%p289_p2), %s343_s26 }
   0xe   : > { %s996_s12 = smov (!%p324_p3, %s758_s12), 1 }
   0xf   : > { %s773_s2 = sshll.u32 %s996_s12, 6 }
  0x10   : > { %s328_s15 = scalar_lea.vmem %s985_s0, %s773_s2  ;;  %s333_s20 = scalar_lea.vmem %s994_s9, %s773_s2 }
  0x11   : > { %v913_v1 = vld [vmem:[%s328_s15 + $0x8] sm:$0xff]  ;;  %v915_v2 = vld [vmem:[%s328_s15 + $0x18] sm:$0xff]  ;;  %v917_v3 = vld [vmem:[%s328_s15] sm:$0xff] }
  0x12   : > { %v798_v4 = vpack.c.bf16 %v915_v2, %v913_v1  ;;  %v921_v5 = vld [vmem:[%s328_s15 + $0x10] sm:$0xff]  ;;  %v923_v6 = vld [vmem:[%s328_s15 + $0x28] sm:$0xff]  ;;  %v925_v7 = vld [vmem:[%s328_s15 + $0x38] sm:$0xff] }
  0x13   : > { %v800_v8 = vpack.c.bf16 %v921_v5, %v917_v3  ;;  %v802_v9 = vpack.c.bf16 %v925_v7, %v923_v6  ;;  %v931_v10 = vld [vmem:[%s328_s15 + $0x20] sm:$0xff]  ;;  %v933_v11 = vld [vmem:[%s328_s15 + $0x30] sm:$0xff] }
  0x14   : > { %799 = vmatprep.subr.bf16.mxu0 %v798_v4  ;;  %807 = vmatprep.subr.bf16.mxu1 %v798_v4  ;;  %v804_v12 = vpack.c.bf16 %v933_v11, %v931_v10 }
  0x15   : > { %801 = vmatpush1.bf16.msra.mxu0 %v800_v8  ;;  %809 = vmatpush1.bf16.xpose.msra.mxu1 %v800_v8 }
  0x16   : > { %803 = vmatprep.subr.bf16.mxu0 %v802_v9  ;;  %811 = vmatprep.subr.bf16.mxu1 %v802_v9 }
  0x19   : > { %805 = vmatpush1.bf16.msra.mxu0 %v804_v12 }
  0x1a   : > { %814 = vmatprep.subr.bf16.mxu0 %v842_v17 }
  0x1c   : > { %767 = vmatmul.mubr.msk.f32.vlgmr.msra.gmra.mrb[0].mxu0 %vm345_vm0, %v342_v13 }
  0x1d   : > { %813 = vmatpush1.bf16.xpose.msra.mxu1 %v804_v12  ;;  %816 = vmatpush3.bf16.msra.mxu0 %v815_v18 }
  0x1e   : > { %817 = vmatprep.subr.bf16.mxu0 %v842_v17  ;;  %790 = vmatprep.mubr.msk.f32.mxu0 %vm843_vm1, %v841_v0 }
  0x21   : > { %819 = vmatpush3.bf16.msra.mxu0 %v818_v20 }
  0x22   : > { %793 = vmatprep.subr.mxu0 %v841_v0 }
  0xef   : > { %v415_v22 = vpop.f32.mrb[0].mxu0 }
  0xf0   : > { %v417_v23 = vpop.f32.mrb[1].mxu0  ;;  %v416_v25 = vadd.f32 %v415_v22, %v344_v21 }
  0xf1   : > { %v418_v24 = vadd.f32 %v417_v23, %v344_v21 }
  0xf3   : > { %484 = vmatprep.mubr.f32.mxu1 %v418_v24 }
  0xf4   : > { %485 = vmatmul.mubr.f32.vlgmr.msra.gmra.mrb[0].mxu1 %v416_v25 }
 0x1c7   : > { %v486_v26 = vpop.f32.mrb[0].mxu1 }
 0x1c8   : > { %v488_v27 = vpop.f32.mrb[1].mxu1  ;;  %791 = vmatmul.mubr.msk.f32.vlgmr.msra.gmra.mrb[2].mxu0 %vm345_vm0, %v486_v26 }
 0x1c9   : > { %795 = vmatprep.mubr.msk.f32.mxu0 %vm843_vm1, %v841_v0  ;;  %794 = vmatpush3.msk.msra.mxu0 %vm594_vm3, %v497_v38 }
 0x29b   : > { %v568_v29 = vpop.f32.mrb[2].mxu0 }
 0x29c   : > { %v569_v30 = vadd.f32 %v568_v29, %v494_v28  ;;  %v792_v31 = vpop.f32.mrb[3].mxu0 }
 0x29e   : > { %v573_v32 = vsel %vm572_vm2, %v569_v30, 0.0 }
 0x29f   : > { %574 = vadd.xlane.f32.xlu0 %v573_v32 }
 0x32c   : > { %v575_v33 = vpop.xlane.xlu0 %574 }
 0x32d   : > { %v577_v34 = vmul.f32 0.5, %v575_v33 }
 0x32f   : > { %v578_v35 = vsub.f32 %v569_v30, %v577_v34 }
 0x331   : > { %v579_v36 = vmul.f32 %v578_v35, %v578_v35 }
 0x333   : > { %v580_v37 = vsel %vm572_vm2, %v579_v36, 0.0 }
 0x334   : > { %581 = vadd.xlane.f32.xlu0 %v580_v37 }
 0x3c1   : > { %v582_v39 = vpop.xlane.xlu0 %581 }
 0x3c2   : > { %v583_v40 = vmul.f32 0.5, %v582_v39 }
 0x3c4   : > { %v584_v41 = vadd.f32 1e-05, %v583_v40 }
 0x3c6   : > { %831 = vrsqrt.f32 %v584_v41 }
 0x3d0   : > { %v832_v42 = vpop.eup %831 }
 0x3d1   : > { %v586_v44 = vmul.f32 %v832_v42, %v578_v35 }
 0x3d3   : > { %v587_v46 = vmul.f32 %v586_v44, %v495_v43 }
 0x3d5   : > { %v588_v47 = vadd.f32 %v587_v46, %v496_v45 }
 0x3d7   : > { %v589_v48 = vmax.f32 %v588_v47, 0.0 }
 0x3d9   : > { %796 = vmatmul.mubr.msk.f32.vlgmr.msra.gmra.mrb[4].mxu0 %vm590_vm4, %v589_v48 }
 0x4ac   : > { %v664_v53 = vpop.f32.mrb[4].mxu0 }
 0x4ad   : > { %v665_v54 = vadd.f32 %v664_v53, %v498_v51  ;;  %v797_v55 = vpop.f32.mrb[5].mxu0 }
 0x4af   : > { %v671_v56 = vrot.slane %v665_v54, %v670_v52 }
 0x4b1   : > { %681 = vbcast.lane.b32.xlu0 %v671_v56, 272  ;;  %673 = vbcast.lane.b32.xlu1 %v671_v56, 256 }
 0x4b5   : > { %677 = vbcast.lane.b32.xlu1 %v671_v56, 264 }
 0x4b9   : > { %685 = vbcast.lane.b32.xlu1 %v671_v56, 280 }
 0x523   : > { %v682_v57 = vpop.permute.xlu0 %681  ;;  %v674_v58 = vpop.permute.xlu1 %673 }
 0x524   : > { %v691_v59 = vadd.f32 %v682_v57, %v931_v10  ;;  %v692_v60 = vadd.f32 %v682_v57, %v923_v6  ;;  %v687_v61 = vadd.f32 %v674_v58, %v917_v3  ;;  %v688_v62 = vadd.f32 %v674_v58, %v913_v1 }
 0x526   : > { %699 = vst [vmem:[%s333_s20 + $0x20] sm:$0xff] %v691_v59  ;;  %700 = vst [vmem:[%s333_s20 + $0x28] sm:$0xff] %v692_v60 }
 0x527   : > { %695 = vst [vmem:[%s333_s20] sm:$0xff] %v687_v61  ;;  %696 = vst [vmem:[%s333_s20 + $0x8] sm:$0xff] %v688_v62  ;;  %v678_v63 = vpop.permute.xlu1 %677 }
 0x528   : > { %v689_v0 = vadd.f32 %v678_v63, %v921_v5  ;;  %v690_v4 = vadd.f32 %v678_v63, %v915_v2 }
 0x52a   : > { %697 = vst [vmem:[%s333_s20 + $0x10] sm:$0xff] %v689_v0  ;;  %698 = vst [vmem:[%s333_s20 + $0x18] sm:$0xff] %v690_v4 }
 0x52b   : > { %v686_v8 = vpop.permute.xlu1 %685 }
 0x52c   : > { %v693_v9 = vadd.f32 %v686_v8, %v933_v11  ;;  %v694_v6 = vadd.f32 %v686_v8, %v925_v7 }
 0x52e   : > { %701 = vst [vmem:[%s333_s20 + $0x30] sm:$0xff] %v693_v9  ;;  %702 = vst [vmem:[%s333_s20 + $0x38] sm:$0xff] %v694_v6 }
 0x52f PF: > { %s20_s11 = sadd.s32 1, %s839_s11  }
 0x530   : > { %p17_p4 = scmp.ge.s32.totalorder %s20_s11, 4  }
 0x532   :  { %19 = sbr.rel (!%p17_p4) target bundleno = 2 (0x2), region = 86 }

</bundles_post_ra>
